<compile_context>
chip_gen: v7x
topology: tpu7x:2x2x1
jax: 0.10.0
libtpu: 0.0.40
codegen_flags: <defaults>
</compile_context>

<pallas_src>
import functools

import jax
import jax.numpy as jnp
import numpy as np
from jax.experimental import pallas as pl
from jax.experimental.pallas import tpu as pltpu


def _round_up(n, m):
    return ((n + m - 1) // m) * m


# ----------------------------------------------------------------------------
# Kernel: fused Flatten -> Linear -> ReLU -> Linear -> Softplus
# ----------------------------------------------------------------------------
def mlp_kernel(x_ref, w1_ref, b1_ref, w2_ref, b2_ref, o_ref):
    x = x_ref[...]                                                    # (Bp, K)
    h = jnp.dot(x, w1_ref[...], preferred_element_type=jnp.float32)   # (Bp, H)
    h = jnp.maximum(h + b1_ref[...], 0.0)                             # bias + ReLU (VPU)
    e = jnp.dot(h, w2_ref[...], preferred_element_type=jnp.float32)   # (Bp, Np)
    e = e + b2_ref[...]
    # Numerically stable softplus: max(e,0) + log(1 + exp(-|e|))  (EUP exp/log)
    o_ref[...] = (jnp.maximum(e, 0.0)
                  + jnp.log(1.0 + jnp.exp(-jnp.abs(e)))).astype(o_ref.dtype)


# ----------------------------------------------------------------------------
# One-time parameter prep (hoisted out of the per-call path)
# ----------------------------------------------------------------------------
def prepare_params(w1, b1, w2, b2):
    """Cast to f32, reshape biases to 2D, pad the head to a 128-wide slab."""
    din, hidden = w1.shape
    nout = w2.shape[1]
    k_pad = _round_up(din, 128)
    h_pad = _round_up(hidden, 128)
    n_pad = _round_up(max(nout, 1), 128)

    w1f = w1.astype(jnp.float32)
    b1f = b1.astype(jnp.float32).reshape(1, hidden)
    # Only materialize padded copies when padding is actually needed
    # (a no-op at dims[0]=1024, hidden=256).
    if (k_pad, h_pad) != (din, hidden):
        w1f = jnp.zeros((k_pad, h_pad), jnp.float32).at[:din, :hidden].set(w1f)
    if h_pad != hidden:
        b1f = jnp.zeros((1, h_pad), jnp.float32).at[:, :hidden].set(b1f)

    # The head (num_views, e.g. 6 lanes) does need zero padding to 128 lanes so
    # the output store is an unmasked, lane-dense vst.
    w2_p = jnp.zeros((h_pad, n_pad), jnp.float32).at[:hidden, :nout].set(
        w2.astype(jnp.float32))
    b2_p = jnp.zeros((1, n_pad), jnp.float32).at[0, :nout].set(
        b2.astype(jnp.float32))
    return w1f, b1f, w2_p, b2_p, nout


# ----------------------------------------------------------------------------
# Per-call forward: reshape/pad x, one fused pallas_call, slice padding off
# ----------------------------------------------------------------------------
@functools.partial(jax.jit, static_argnames=("nout",))
def mlp_forward(x, w1, b1, w2_p, b2_p, *, nout):
    batch = x.shape[0]
    x2 = x.reshape(batch, -1).astype(jnp.float32)       # Flatten
    din = x2.shape[1]
    k_pad = w1.shape[0]
    hidden = w1.shape[1]
    n_pad = w2_p.shape[1]
    b_pad = _round_up(batch, 8)                          # sublane multiple

    if (b_pad, k_pad) != (batch, din):
        x_p = jnp.zeros((b_pad, k_pad), jnp.float32).at[:batch, :din].set(x2)
    else:
        x_p = x2

    # Honest scheduler hint (true head width, not padded lanes).
    flops = 2 * b_pad * din * hidden + 2 * b_pad * hidden * nout
    bytes_accessed = 4 * (x_p.size + w1.size + b1.size + w2_p.size + b2_p.size
                          + b_pad * n_pad)
    cost = pl.CostEstimate(flops=flops,
                           transcendentals=2 * b_pad * nout,  # exp + log per out elem
                           bytes_accessed=bytes_accessed)

    vmem_spec = pl.BlockSpec(memory_space=pltpu.MemorySpace.VMEM)
    out_p = pl.pallas_call(
        mlp_kernel,
        in_specs=[vmem_spec] * 5,
        out_specs=vmem_spec,
        out_shape=jax.ShapeDtypeStruct((b_pad, n_pad), jnp.float32),
        cost_estimate=cost,
    )(x_p, w1, b1, w2_p, b2_p)

    return out_p[:batch, :nout]


# ----------------------------------------------------------------------------
# Pure-JAX reference (for verification)
# ----------------------------------------------------------------------------
def _ref_forward(x, w1, b1, w2, b2):
    h = x.reshape(x.shape[0], -1)
    h = jnp.maximum(
        jnp.dot(h, w1, precision=jax.lax.Precision.HIGHEST) + b1, 0.0)
    e = jnp.dot(h, w2, precision=jax.lax.Precision.HIGHEST) + b2
    return jax.nn.softplus(e)


# ----------------------------------------------------------------------------
# Main
# ----------------------------------------------------------------------------
if __name__ == "__main__":
    # Shapes implied by the module: Flatten -> Linear(dims[0], 256) -> ReLU
    #                               -> Linear(256, num_views) -> Softplus
    batch, channels, spatial = 2, 4, 16
    dims0 = channels * spatial * spatial       # 1024
    hidden = 256
    num_views = 6                              # head width
    num_classes = 4                            # unused in forward (kept for parity)

    key = jax.random.PRNGKey(0)
    kx, kw1, kb1, kw2, kb2 = jax.random.split(key, 5)

    x = jax.random.normal(kx, (batch, channels, spatial, spatial), jnp.float32)
    w1 = jax.random.normal(kw1, (dims0, hidden), jnp.float32) * (1.0 / np.sqrt(dims0))
    b1 = jax.random.normal(kb1, (hidden,), jnp.float32) * 0.1
    w2 = jax.random.normal(kw2, (hidden, num_views), jnp.float32) * (1.0 / np.sqrt(hidden))
    b2 = jax.random.normal(kb2, (num_views,), jnp.float32) * 0.1

    # One-time weight prep (outside the hot per-call path).
    w1f, b1f, w2_p, b2_p, nout = prepare_params(w1, b1, w2, b2)
    w1f, b1f, w2_p, b2_p = jax.block_until_ready((w1f, b1f, w2_p, b2_p))

    out = mlp_forward(x, w1f, b1f, w2_p, b2_p, nout=nout)
    out = jax.block_until_ready(out)

    ref = _ref_forward(x, w1, b1, w2, b2)
    np.testing.assert_allclose(np.asarray(out), np.asarray(ref),
                               rtol=1e-4, atol=1e-4)

    print("KERNEL_OK")
</pallas_src>

<mosaic_0001>
module attributes {stable_mosaic.version = 11 : i64} {
  func.func @mlp_kernel(%arg0: memref<8x1024xf32, #tpu.memory_space<vmem>>, %arg1: memref<1024x256xf32, #tpu.memory_space<vmem>>, %arg2: memref<1x256xf32, #tpu.memory_space<vmem>>, %arg3: memref<256x128xf32, #tpu.memory_space<vmem>>, %arg4: memref<1x128xf32, #tpu.memory_space<vmem>>, %arg5: memref<8x128xf32, #tpu.memory_space<vmem>>) attributes {dimension_semantics = [], scalar_prefetch = 0 : i64, scratch_operands = 0 : i64, tpu.core_type = #tpu.core_type<tc>} {
    %c0 = arith.constant 0 : index
    %c0_0 = arith.constant 0 : index
    %0 = vector.load %arg0[%c0, %c0_0] : memref<8x1024xf32, #tpu.memory_space<vmem>>, vector<8x1024xf32>
    %c0_1 = arith.constant 0 : index
    %c0_2 = arith.constant 0 : index
    %1 = vector.load %arg1[%c0_1, %c0_2] : memref<1024x256xf32, #tpu.memory_space<vmem>>, vector<1024x256xf32>
    %cst = arith.constant dense<0.000000e+00> : vector<8x256xf32>
    %2 = tpu.matmul %0, %1, %cst {dimension_numbers = #tpu.dot_dimension_numbers<[1], [0], [0], [1], [0, 0, 1, 1], [], []>} : vector<8x1024xf32>, vector<1024x256xf32>, vector<8x256xf32> -> vector<8x256xf32>
    %c0_3 = arith.constant 0 : index
    %c0_4 = arith.constant 0 : index
    %3 = vector.load %arg2[%c0_3, %c0_4] : memref<1x256xf32, #tpu.memory_space<vmem>>, vector<1x256xf32>
    %4 = vector.broadcast %3 : vector<1x256xf32> to vector<8x256xf32>
    %5 = arith.addf %2, %4 : vector<8x256xf32>
    %cst_5 = arith.constant 0.000000e+00 : f32
    %6 = vector.broadcast %cst_5 : f32 to vector<8x256xf32>
    %7 = arith.maximumf %5, %6 : vector<8x256xf32>
    %c0_6 = arith.constant 0 : index
    %c0_7 = arith.constant 0 : index
    %8 = vector.load %arg3[%c0_6, %c0_7] : memref<256x128xf32, #tpu.memory_space<vmem>>, vector<256x128xf32>
    %cst_8 = arith.constant dense<0.000000e+00> : vector<8x128xf32>
    %9 = tpu.matmul %7, %8, %cst_8 {dimension_numbers = #tpu.dot_dimension_numbers<[1], [0], [0], [1], [0, 0, 1, 1], [], []>} : vector<8x256xf32>, vector<256x128xf32>, vector<8x128xf32> -> vector<8x128xf32>
    %c0_9 = arith.constant 0 : index
    %c0_10 = arith.constant 0 : index
    %10 = vector.load %arg4[%c0_9, %c0_10] : memref<1x128xf32, #tpu.memory_space<vmem>>, vector<1x128xf32>
    %11 = vector.broadcast %10 : vector<1x128xf32> to vector<8x128xf32>
    %12 = arith.addf %9, %11 : vector<8x128xf32>
    %cst_11 = arith.constant 0.000000e+00 : f32
    %13 = vector.broadcast %cst_11 : f32 to vector<8x128xf32>
    %14 = arith.maximumf %12, %13 : vector<8x128xf32>
    %15 = math.absf %12 : vector<8x128xf32>
    %cst_12 = arith.constant 0.000000e+00 : f32
    %16 = vector.broadcast %cst_12 : f32 to vector<8x128xf32>
    %17 = arith.subf %16, %15 : vector<8x128xf32>
    %18 = math.exp %17 : vector<8x128xf32>
    %cst_13 = arith.constant 1.000000e+00 : f32
    %19 = vector.broadcast %cst_13 : f32 to vector<8x128xf32>
    %20 = arith.addf %19, %18 : vector<8x128xf32>
    %21 = math.log %20 : vector<8x128xf32>
    %22 = arith.addf %14, %21 : vector<8x128xf32>
    %c0_14 = arith.constant 0 : index
    %c0_15 = arith.constant 0 : index
    %23 = vector.load %arg5[%c0_14, %c0_15] : memref<8x128xf32, #tpu.memory_space<vmem>>, vector<8x128xf32>
    tpu.vector_store %arg5[%c0_14, %c0_15], %22 {strides = array<i32>} : memref<8x128xf32, #tpu.memory_space<vmem>>, vector<8x128xf32>,
    return
  }
}

</mosaic_0001>

<bundles_post_ra>
// kernel: mlp_forward.1
= control target key start
LH: loop header
LB: loop body
LE: loop exit
PB: predicated region body
PF: predicated region fallthrough
CT: control target
= control target key end

     0   :  { %10 = vsyncpa [#allocation3], 0  ;;  %s1218_s0 = inlined_call_operand.vmem [shape: f32[8,1024], index: 0, kind: input, shape index: {}]   ;;  %s1219_s1 = inlined_call_operand.hbm [shape: f32[1024,256], index: 1, kind: input, shape index: {}]   ;;  %s1220_s2 = inlined_call_operand.vmem [shape: f32[1,256], index: 2, kind: input, shape index: {}]   ;;  %s1221_s3 = inlined_call_operand.hbm [shape: f32[256,128], index: 3, kind: input, shape index: {}]   ;;  %s1222_s4 = inlined_call_operand.vmem [shape: f32[1,128], index: 4, kind: input, shape index: {}]   ;;  %s1223_s5 = inlined_call_operand.vmem [shape: f32[8,128], index: 5, kind: output, shape index: {}]  }
   0x1   :  { %11 = vsyncpa [#allocation5], 0  ;;  %s1125_s18 = smov [#allocation2]   ;;  %s1077_s22 = scalar_lea.hbm %s1219_s1, 32768 }
   0x2   :  { %s19_s19 = sshll.u32 %s1125_s18, 4  ;;  %p1078_p0 = scmp.ne.s32.totalorder %s1219_s1, %s1077_s22  ;;  %s20_s19 = int_to_ptr.vmem [resolvable:$true] %s19_s19 }
   0x3   :  { %p1081_p1 = scmp.lt.u32.totalorder %s1077_s22, %s1219_s1 }
   0x5   :  { %p1083_p2 = pnand %p1081_p1, %p1078_p0 }
   0x7   :  { %1086 = shalt.err (!%p1083_p2)
}
   0x8   :  { %s1087_s27 = scalar_lea.vmem %s20_s19, 32768  ;;  %p1092_p4 = scmp.lt.s32.totalorder %s20_s19, %s20_s19 }
   0x9   :  { %p1088_p3 = scmp.ne.s32.totalorder %s20_s19, %s1087_s27  ;;  %p1093_p5 = scmp.lt.s32.totalorder %s1087_s27, %s1087_s27 }
   0xb   :  { %p1094_p6 = por %p1093_p5, %p1092_p4 }
   0xd   :  { %p1095_p7 = pnand %p1094_p6, %p1088_p3 }
   0xf   :  { %1098 = shalt.err (!%p1095_p7)
}
  0x10   :  { %s1126_s28 = smov 256   ;;  %s1127_s29 = smov 16  }
  0x11   :  { %25 = dma.hbm_to_vmem [thread:$0]  %s1219_s1, 32768, %s20_s19, [#allocation3], %s1126_s28, %s1126_s28, %s1127_s29  }
  0x12   :  { %s1128_s7 = smov [#allocation4]   ;;  %s1099_s11 = scalar_lea.hbm %s1221_s3, 4096 }
  0x13   :  { %s33_s8 = sshll.u32 %s1128_s7, 4  ;;  %p1100_p8 = scmp.ne.s32.totalorder %s1221_s3, %s1099_s11  ;;  %s34_s8 = int_to_ptr.vmem [resolvable:$true] %s33_s8 }
  0x14   :  { %p1103_p9 = scmp.lt.u32.totalorder %s1099_s11, %s1221_s3 }
  0x16   :  { %p1105_p10 = pnand %p1103_p9, %p1100_p8 }
  0x18   :  { %1108 = shalt.err (!%p1105_p10)
}
  0x19   :  { %s1109_s16 = scalar_lea.vmem %s34_s8, 4096  ;;  %p1114_p12 = scmp.lt.s32.totalorder %s34_s8, %s34_s8 }
  0x1a   :  { %p1110_p11 = scmp.ne.s32.totalorder %s34_s8, %s1109_s16  ;;  %p1115_p13 = scmp.lt.s32.totalorder %s1109_s16, %s1109_s16 }
  0x1c   :  { %p1116_p0 = por %p1115_p13, %p1114_p12 }
  0x1e   :  { %p1117_p1 = pnand %p1116_p0, %p1110_p11 }
  0x20   :  { %1120 = shalt.err (!%p1117_p1)
}
  0x21   :  { %s1129_s1 = smov 128   ;;  %s1130_s17 = smov 8  }
  0x22   :  { %39 = dma.hbm_to_vmem [thread:$0]  %s1221_s3, 4096, %s34_s8, [#allocation5], %s1129_s1, %s1129_s1, %s1130_s17  }
  0x23   :  { %1121 = dma.done.wait [#allocation3], 32768  }
  0x24   :  { %1122 = vsyncadd [#allocation3], 4294934528 }
  0x25   :  { %1123 = dma.done.wait [#allocation5], 4096  }
  0x26   :  { %1124 = vsyncadd [#allocation5], 4294963200  ;;  %v57_v0 = vld [vmem:[#allocation2 + $0x8] sm:$0xff]  ;;  %v59_v1 = vld [vmem:[#allocation2 + $0x18] sm:$0xff] }
  0x27   :  { %v185_v2 = vld [vmem:[#allocation2 + $0x408] sm:$0xff]  ;;  %v771_v3 = vpack.c.bf16 %v59_v1, %v57_v0  ;;  %v187_v4 = vld [vmem:[#allocation2 + $0x418] sm:$0xff]  ;;  %v56_v5 = vld [vmem:[#allocation2] sm:$0xff] }
  0x28   :  { %v58_v6 = vld [vmem:[#allocation2 + $0x10] sm:$0xff]  ;;  %v899_v7 = vpack.c.bf16 %v187_v4, %v185_v2  ;;  %v184_v9 = vld [vmem:[#allocation2 + $0x400] sm:$0xff]  ;;  %v61_v11 = vld [vmem:[#allocation2 + $0x28] sm:$0xff] }
  0x29   :  { %v773_v8 = vpack.c.bf16 %v58_v6, %v56_v5  ;;  %v186_v10 = vld [vmem:[#allocation2 + $0x410] sm:$0xff]  ;;  %772 = vmatprep.subr.bf16.mxu1 %v771_v3  ;;  %v63_v13 = vld [vmem:[#allocation2 + $0x38] sm:$0xff]  ;;  %v189_v14 = vld [vmem:[#allocation2 + $0x428] sm:$0xff] }
  0x2a   :  { %v901_v12 = vpack.c.bf16 %v186_v10, %v184_v9  ;;  %v191_v15 = vld [vmem:[#allocation2 + $0x438] sm:$0xff]  ;;  %900 = vmatprep.subr.bf16.mxu0 %v899_v7  ;;  %v775_v16 = vpack.c.bf16 %v63_v13, %v61_v11  ;;  %v60_v18 = vld [vmem:[#allocation2 + $0x20] sm:$0xff]  ;;  %v62_v19 = vld [vmem:[#allocation2 + $0x30] sm:$0xff] }
  0x2b   :  { %774 = vmatpush1.bf16.msra.mxu1 %v773_v8  ;;  %v903_v17 = vpack.c.bf16 %v191_v15, %v189_v14  ;;  %v188_v20 = vld [vmem:[#allocation2 + $0x420] sm:$0xff]  ;;  %v777_v21 = vpack.c.bf16 %v62_v19, %v60_v18  ;;  %v190_v22 = vld [vmem:[#allocation2 + $0x430] sm:$0xff]  ;;  %v65_v23 = vld [vmem:[#allocation2 + $0x48] sm:$0xff] }
  0x2c   :  { %902 = vmatpush1.bf16.msra.mxu0 %v901_v12  ;;  %v67_v24 = vld [vmem:[#allocation2 + $0x58] sm:$0xff]  ;;  %776 = vmatprep.subr.bf16.mxu1 %v775_v16  ;;  %v905_v25 = vpack.c.bf16 %v190_v22, %v188_v20  ;;  %v193_v27 = vld [vmem:[#allocation2 + $0x448] sm:$0xff]  ;;  %v64_v29 = vld [vmem:[#allocation2 + $0x40] sm:$0xff] }
  0x2d   :  { %904 = vmatprep.subr.bf16.mxu0 %v903_v17  ;;  %v779_v26 = vpack.c.bf16 %v67_v24, %v65_v23  ;;  %v195_v28 = vld [vmem:[#allocation2 + $0x458] sm:$0xff]  ;;  %v66_v31 = vld [vmem:[#allocation2 + $0x50] sm:$0xff]  ;;  %v192_v32 = vld [vmem:[#allocation2 + $0x440] sm:$0xff] }
  0x2e   :  { %v907_v30 = vpack.c.bf16 %v195_v28, %v193_v27  ;;  %v194_v33 = vld [vmem:[#allocation2 + $0x450] sm:$0xff]  ;;  %v781_v34 = vpack.c.bf16 %v66_v31, %v64_v29  ;;  %v69_v35 = vld [vmem:[#allocation2 + $0x68] sm:$0xff]  ;;  %v71_v36 = vld [vmem:[#allocation2 + $0x78] sm:$0xff] }
  0x2f   :  { %778 = vmatpush1.bf16.msra.mxu1 %v777_v21  ;;  %v197_v37 = vld [vmem:[#allocation2 + $0x468] sm:$0xff]  ;;  %v909_v38 = vpack.c.bf16 %v194_v33, %v192_v32  ;;  %v783_v39 = vpack.c.bf16 %v71_v36, %v69_v35  ;;  %v199_v40 = vld [vmem:[#allocation2 + $0x478] sm:$0xff]  ;;  %v68_v41 = vld [vmem:[#allocation2 + $0x60] sm:$0xff] }
  0x30   :  { %906 = vmatpush1.bf16.msra.mxu0 %v905_v25  ;;  %780 = vmatprep.subr.bf16.mxu1 %v779_v26  ;;  %v70_v42 = vld [vmem:[#allocation2 + $0x70] sm:$0xff]  ;;  %v911_v43 = vpack.c.bf16 %v199_v40, %v197_v37  ;;  %v196_v44 = vld [vmem:[#allocation2 + $0x460] sm:$0xff]  ;;  %v73_v46 = vld [vmem:[#allocation2 + $0x88] sm:$0xff] }
  0x31   :  { %908 = vmatprep.subr.bf16.mxu0 %v907_v30  ;;  %v198_v45 = vld [vmem:[#allocation2 + $0x470] sm:$0xff]  ;;  %v75_v47 = vld [vmem:[#allocation2 + $0x98] sm:$0xff]  ;;  %v201_v48 = vld [vmem:[#allocation2 + $0x488] sm:$0xff]  ;;  %v785_v50 = vpack.c.bf16 %v70_v42, %v68_v41 }
  0x32   :  { %v203_v49 = vld [vmem:[#allocation2 + $0x498] sm:$0xff]  ;;  %v913_v51 = vpack.c.bf16 %v198_v45, %v196_v44  ;;  %v787_v52 = vpack.c.bf16 %v75_v47, %v73_v46  ;;  %v72_v53 = vld [vmem:[#allocation2 + $0x80] sm:$0xff]  ;;  %v74_v54 = vld [vmem:[#allocation2 + $0x90] sm:$0xff] }
  0x33   :  { %782 = vmatpush1.bf16.msra.mxu1 %v781_v34  ;;  %v200_v55 = vld [vmem:[#allocation2 + $0x480] sm:$0xff]  ;;  %v915_v56 = vpack.c.bf16 %v203_v49, %v201_v48  ;;  %v202_v57 = vld [vmem:[#allocation2 + $0x490] sm:$0xff]  ;;  %v77_v58 = vld [vmem:[#allocation2 + $0xa8] sm:$0xff]  ;;  %v789_v62 = vpack.c.bf16 %v74_v54, %v72_v53 }
  0x34   :  { %910 = vmatpush1.bf16.msra.mxu0 %v909_v38  ;;  %784 = vmatprep.subr.bf16.mxu1 %v783_v39  ;;  %v79_v59 = vld [vmem:[#allocation2 + $0xb8] sm:$0xff]  ;;  %v205_v60 = vld [vmem:[#allocation2 + $0x4a8] sm:$0xff]  ;;  %v917_v63 = vpack.c.bf16 %v202_v57, %v200_v55  ;;  %v76_v1 = vld [vmem:[#allocation2 + $0xa0] sm:$0xff] }
  0x35   :  { %912 = vmatprep.subr.bf16.mxu0 %v911_v43  ;;  %v207_v61 = vld [vmem:[#allocation2 + $0x4b8] sm:$0xff]  ;;  %v791_v0 = vpack.c.bf16 %v79_v59, %v77_v58  ;;  %v78_v2 = vld [vmem:[#allocation2 + $0xb0] sm:$0xff]  ;;  %v204_v3 = vld [vmem:[#allocation2 + $0x4a0] sm:$0xff] }
  0x36   :  { %v919_v4 = vpack.c.bf16 %v207_v61, %v205_v60  ;;  %v206_v5 = vld [vmem:[#allocation2 + $0x4b0] sm:$0xff]  ;;  %v81_v6 = vld [vmem:[#allocation2 + $0xc8] sm:$0xff]  ;;  %v83_v7 = vld [vmem:[#allocation2 + $0xd8] sm:$0xff]  ;;  %v793_v10 = vpack.c.bf16 %v78_v2, %v76_v1 }
  0x37   :  { %786 = vmatpush1.bf16.msra.mxu1 %v785_v50  ;;  %v209_v8 = vld [vmem:[#allocation2 + $0x4c8] sm:$0xff]  ;;  %v211_v9 = vld [vmem:[#allocation2 + $0x4d8] sm:$0xff]  ;;  %v921_v11 = vpack.c.bf16 %v206_v5, %v204_v3  ;;  %v795_v12 = vpack.c.bf16 %v83_v7, %v81_v6  ;;  %v80_v13 = vld [vmem:[#allocation2 + $0xc0] sm:$0xff] }
  0x38   :  { %914 = vmatpush1.bf16.msra.mxu0 %v913_v51  ;;  %788 = vmatprep.subr.bf16.mxu1 %v787_v52  ;;  %v82_v14 = vld [vmem:[#allocation2 + $0xd0] sm:$0xff]  ;;  %v208_v15 = vld [vmem:[#allocation2 + $0x4c0] sm:$0xff]  ;;  %v923_v16 = vpack.c.bf16 %v211_v9, %v209_v8  ;;  %v85_v18 = vld [vmem:[#allocation2 + $0xe8] sm:$0xff] }
  0x39   :  { %916 = vmatprep.subr.bf16.mxu0 %v915_v56  ;;  %v210_v17 = vld [vmem:[#allocation2 + $0x4d0] sm:$0xff]  ;;  %v87_v19 = vld [vmem:[#allocation2 + $0xf8] sm:$0xff]  ;;  %v213_v20 = vld [vmem:[#allocation2 + $0x4e8] sm:$0xff]  ;;  %v797_v22 = vpack.c.bf16 %v82_v14, %v80_v13 }
  0x3a   :  { %v215_v21 = vld [vmem:[#allocation2 + $0x4f8] sm:$0xff]  ;;  %v925_v23 = vpack.c.bf16 %v210_v17, %v208_v15  ;;  %v799_v24 = vpack.c.bf16 %v87_v19, %v85_v18  ;;  %v84_v25 = vld [vmem:[#allocation2 + $0xe0] sm:$0xff]  ;;  %v86_v26 = vld [vmem:[#allocation2 + $0xf0] sm:$0xff] }
  0x3b   :  { %790 = vmatpush1.bf16.msra.mxu1 %v789_v62  ;;  %v212_v27 = vld [vmem:[#allocation2 + $0x4e0] sm:$0xff]  ;;  %v927_v28 = vpack.c.bf16 %v215_v21, %v213_v20  ;;  %v214_v29 = vld [vmem:[#allocation2 + $0x4f0] sm:$0xff]  ;;  %v89_v30 = vld [vmem:[#allocation2 + $0x108] sm:$0xff]  ;;  %v801_v34 = vpack.c.bf16 %v86_v26, %v84_v25 }
  0x3c   :  { %918 = vmatpush1.bf16.msra.mxu0 %v917_v63  ;;  %792 = vmatprep.subr.bf16.mxu1 %v791_v0  ;;  %v91_v31 = vld [vmem:[#allocation2 + $0x118] sm:$0xff]  ;;  %v217_v32 = vld [vmem:[#allocation2 + $0x508] sm:$0xff]  ;;  %v929_v35 = vpack.c.bf16 %v214_v29, %v212_v27  ;;  %v88_v37 = vld [vmem:[#allocation2 + $0x100] sm:$0xff] }
  0x3d   :  { %920 = vmatprep.subr.bf16.mxu0 %v919_v4  ;;  %v219_v33 = vld [vmem:[#allocation2 + $0x518] sm:$0xff]  ;;  %v803_v36 = vpack.c.bf16 %v91_v31, %v89_v30  ;;  %v90_v38 = vld [vmem:[#allocation2 + $0x110] sm:$0xff]  ;;  %v216_v39 = vld [vmem:[#allocation2 + $0x500] sm:$0xff] }
  0x3e   :  { %v931_v40 = vpack.c.bf16 %v219_v33, %v217_v32  ;;  %v218_v41 = vld [vmem:[#allocation2 + $0x510] sm:$0xff]  ;;  %v93_v42 = vld [vmem:[#allocation2 + $0x128] sm:$0xff]  ;;  %v95_v43 = vld [vmem:[#allocation2 + $0x138] sm:$0xff]  ;;  %v805_v46 = vpack.c.bf16 %v90_v38, %v88_v37 }
  0x3f   :  { %794 = vmatpush1.bf16.msra.mxu1 %v793_v10  ;;  %v221_v44 = vld [vmem:[#allocation2 + $0x528] sm:$0xff]  ;;  %v223_v45 = vld [vmem:[#allocation2 + $0x538] sm:$0xff]  ;;  %v933_v47 = vpack.c.bf16 %v218_v41, %v216_v39  ;;  %v807_v48 = vpack.c.bf16 %v95_v43, %v93_v42  ;;  %v92_v49 = vld [vmem:[#allocation2 + $0x120] sm:$0xff] }
  0x40   :  { %922 = vmatpush1.bf16.msra.mxu0 %v921_v11  ;;  %796 = vmatprep.subr.bf16.mxu1 %v795_v12  ;;  %v94_v50 = vld [vmem:[#allocation2 + $0x130] sm:$0xff]  ;;  %v220_v51 = vld [vmem:[#allocation2 + $0x520] sm:$0xff]  ;;  %v935_v52 = vpack.c.bf16 %v223_v45, %v221_v44  ;;  %v97_v54 = vld [vmem:[#allocation2 + $0x148] sm:$0xff] }
  0x41   :  { %924 = vmatprep.subr.bf16.mxu0 %v923_v16  ;;  %v222_v53 = vld [vmem:[#allocation2 + $0x530] sm:$0xff]  ;;  %v99_v55 = vld [vmem:[#allocation2 + $0x158] sm:$0xff]  ;;  %v225_v56 = vld [vmem:[#allocation2 + $0x548] sm:$0xff]  ;;  %v809_v58 = vpack.c.bf16 %v94_v50, %v92_v49 }
  0x42   :  { %v227_v57 = vld [vmem:[#allocation2 + $0x558] sm:$0xff]  ;;  %v937_v59 = vpack.c.bf16 %v222_v53, %v220_v51  ;;  %v811_v60 = vpack.c.bf16 %v99_v55, %v97_v54  ;;  %v96_v61 = vld [vmem:[#allocation2 + $0x140] sm:$0xff]  ;;  %v98_v62 = vld [vmem:[#allocation2 + $0x150] sm:$0xff] }
  0x43   :  { %798 = vmatpush1.bf16.msra.mxu1 %v797_v22  ;;  %v224_v63 = vld [vmem:[#allocation2 + $0x540] sm:$0xff]  ;;  %v939_v0 = vpack.c.bf16 %v227_v57, %v225_v56  ;;  %v226_v1 = vld [vmem:[#allocation2 + $0x550] sm:$0xff]  ;;  %v101_v2 = vld [vmem:[#allocation2 + $0x168] sm:$0xff]  ;;  %v813_v6 = vpack.c.bf16 %v98_v62, %v96_v61 }
  0x44   :  { %926 = vmatpush1.bf16.msra.mxu0 %v925_v23  ;;  %800 = vmatprep.subr.bf16.mxu1 %v799_v24  ;;  %v103_v3 = vld [vmem:[#allocation2 + $0x178] sm:$0xff]  ;;  %v229_v4 = vld [vmem:[#allocation2 + $0x568] sm:$0xff]  ;;  %v100_v7 = vld [vmem:[#allocation2 + $0x160] sm:$0xff]  ;;  %v941_v8 = vpack.c.bf16 %v226_v1, %v224_v63 }
  0x45   :  { %928 = vmatprep.subr.bf16.mxu0 %v927_v28  ;;  %v231_v5 = vld [vmem:[#allocation2 + $0x578] sm:$0xff]  ;;  %v815_v9 = vpack.c.bf16 %v103_v3, %v101_v2  ;;  %v102_v10 = vld [vmem:[#allocation2 + $0x170] sm:$0xff]  ;;  %v228_v11 = vld [vmem:[#allocation2 + $0x560] sm:$0xff] }
  0x46   :  { %v230_v12 = vld [vmem:[#allocation2 + $0x570] sm:$0xff]  ;;  %v943_v13 = vpack.c.bf16 %v231_v5, %v229_v4  ;;  %v105_v14 = vld [vmem:[#allocation2 + $0x188] sm:$0xff]  ;;  %v107_v15 = vld [vmem:[#allocation2 + $0x198] sm:$0xff]  ;;  %v817_v20 = vpack.c.bf16 %v102_v10, %v100_v7 }
  0x47   :  { %802 = vmatpush1.bf16.msra.mxu1 %v801_v34  ;;  %v49_v16 = vld [vmem:[%s1218_s0 + $0x8] sm:$0xff]  ;;  %v235_v18 = vld [vmem:[#allocation2 + $0x598] sm:$0xff]  ;;  %v945_v21 = vpack.c.bf16 %v230_v12, %v228_v11  ;;  %v819_v22 = vpack.c.bf16 %v107_v15, %v105_v14  ;;  %v104_v23 = vld [vmem:[#allocation2 + $0x180] sm:$0xff] }
  0x48   :  { %930 = vmatpush1.bf16.msra.mxu0 %v929_v35  ;;  %804 = vmatprep.subr.bf16.mxu1 %v803_v36  ;;  %v233_v17 = vld [vmem:[#allocation2 + $0x588] sm:$0xff]  ;;  %v106_v24 = vld [vmem:[#allocation2 + $0x190] sm:$0xff]  ;;  %v232_v25 = vld [vmem:[#allocation2 + $0x580] sm:$0xff] }
  0x49   :  { %932 = vmatprep.subr.bf16.mxu0 %v931_v40  ;;  %388 = vmatprep.mubr.f32.mxu1 %v49_v16  ;;  %v53_v19 = vld [vmem:[%s1218_s0 + $0x28] sm:$0xff]  ;;  %v947_v26 = vpack.c.bf16 %v235_v18, %v233_v17  ;;  %v234_v27 = vld [vmem:[#allocation2 + $0x590] sm:$0xff]  ;;  %v111_v29 = vld [vmem:[#allocation2 + $0x1b8] sm:$0xff]  ;;  %v821_v32 = vpack.c.bf16 %v106_v24, %v104_v23 }
  0x4a   :  { %530 = vmatprep.mubr.f32.mxu0 %v53_v19  ;;  %v109_v28 = vld [vmem:[#allocation2 + $0x1a8] sm:$0xff]  ;;  %v239_v31 = vld [vmem:[#allocation2 + $0x5b8] sm:$0xff]  ;;  %v949_v33 = vpack.c.bf16 %v234_v27, %v232_v25  ;;  %v108_v35 = vld [vmem:[#allocation2 + $0x1a0] sm:$0xff] }
  0x4b   :  { %806 = vmatpush1.bf16.msra.mxu1 %v805_v46  ;;  %v237_v30 = vld [vmem:[#allocation2 + $0x5a8] sm:$0xff]  ;;  %v823_v34 = vpack.c.bf16 %v111_v29, %v109_v28  ;;  %v110_v36 = vld [vmem:[#allocation2 + $0x1b0] sm:$0xff]  ;;  %v236_v37 = vld [vmem:[#allocation2 + $0x5a0] sm:$0xff] }
  0x4c   :  { %934 = vmatpush1.bf16.msra.mxu0 %v933_v47  ;;  %808 = vmatprep.subr.bf16.mxu1 %v807_v48  ;;  %v951_v38 = vpack.c.bf16 %v239_v31, %v237_v30  ;;  %v238_v39 = vld [vmem:[#allocation2 + $0x5b0] sm:$0xff]  ;;  %v113_v40 = vld [vmem:[#allocation2 + $0x1c8] sm:$0xff]  ;;  %v115_v41 = vld [vmem:[#allocation2 + $0x1d8] sm:$0xff]  ;;  %v825_v44 = vpack.c.bf16 %v110_v36, %v108_v35 }
  0x4d   :  { %936 = vmatprep.subr.bf16.mxu0 %v935_v52  ;;  %v241_v42 = vld [vmem:[#allocation2 + $0x5c8] sm:$0xff]  ;;  %v243_v43 = vld [vmem:[#allocation2 + $0x5d8] sm:$0xff]  ;;  %v953_v45 = vpack.c.bf16 %v238_v39, %v236_v37  ;;  %v827_v46 = vpack.c.bf16 %v115_v41, %v113_v40  ;;  %v112_v47 = vld [vmem:[#allocation2 + $0x1c0] sm:$0xff] }
  0x4e   :  { %v114_v48 = vld [vmem:[#allocation2 + $0x1d0] sm:$0xff]  ;;  %v240_v49 = vld [vmem:[#allocation2 + $0x5c0] sm:$0xff]  ;;  %v955_v50 = vpack.c.bf16 %v243_v43, %v241_v42  ;;  %v117_v52 = vld [vmem:[#allocation2 + $0x1e8] sm:$0xff] }
  0x4f   :  { %810 = vmatpush1.bf16.msra.mxu1 %v809_v58  ;;  %v242_v51 = vld [vmem:[#allocation2 + $0x5d0] sm:$0xff]  ;;  %v119_v53 = vld [vmem:[#allocation2 + $0x1f8] sm:$0xff]  ;;  %v245_v54 = vld [vmem:[#allocation2 + $0x5e8] sm:$0xff]  ;;  %v829_v56 = vpack.c.bf16 %v114_v48, %v112_v47 }
  0x50   :  { %938 = vmatpush1.bf16.msra.mxu0 %v937_v59  ;;  %812 = vmatprep.subr.bf16.mxu1 %v811_v60  ;;  %v247_v55 = vld [vmem:[#allocation2 + $0x5f8] sm:$0xff]  ;;  %v957_v57 = vpack.c.bf16 %v242_v51, %v240_v49  ;;  %v831_v58 = vpack.c.bf16 %v119_v53, %v117_v52  ;;  %v116_v59 = vld [vmem:[#allocation2 + $0x1e0] sm:$0xff]  ;;  %v118_v60 = vld [vmem:[#allocation2 + $0x1f0] sm:$0xff] }
  0x51   :  { %940 = vmatprep.subr.bf16.mxu0 %v939_v0  ;;  %v244_v61 = vld [vmem:[#allocation2 + $0x5e0] sm:$0xff]  ;;  %v959_v62 = vpack.c.bf16 %v247_v55, %v245_v54  ;;  %v246_v63 = vld [vmem:[#allocation2 + $0x5f0] sm:$0xff]  ;;  %v121_v0 = vld [vmem:[#allocation2 + $0x208] sm:$0xff]  ;;  %v833_v4 = vpack.c.bf16 %v118_v60, %v116_v59 }
  0x52   :  { %v123_v1 = vld [vmem:[#allocation2 + $0x218] sm:$0xff]  ;;  %v249_v2 = vld [vmem:[#allocation2 + $0x608] sm:$0xff]  ;;  %v961_v5 = vpack.c.bf16 %v246_v63, %v244_v61  ;;  %v120_v7 = vld [vmem:[#allocation2 + $0x200] sm:$0xff] }
  0x53   :  { %814 = vmatpush1.bf16.msra.mxu1 %v813_v6  ;;  %v251_v3 = vld [vmem:[#allocation2 + $0x618] sm:$0xff]  ;;  %v835_v6 = vpack.c.bf16 %v123_v1, %v121_v0  ;;  %v250_v11 = vld [vmem:[#allocation2 + $0x610] sm:$0xff]  ;;  %v125_v12 = vld [vmem:[#allocation2 + $0x228] sm:$0xff] }
  0x54   :  { %942 = vmatpush1.bf16.msra.mxu0 %v941_v8  ;;  %816 = vmatprep.subr.bf16.mxu1 %v815_v9  ;;  %v122_v8 = vld [vmem:[#allocation2 + $0x210] sm:$0xff]  ;;  %v248_v9 = vld [vmem:[#allocation2 + $0x600] sm:$0xff]  ;;  %v963_v10 = vpack.c.bf16 %v251_v3, %v249_v2  ;;  %v253_v14 = vld [vmem:[#allocation2 + $0x628] sm:$0xff] }
  0x55   :  { %944 = vmatprep.subr.bf16.mxu0 %v943_v13  ;;  %v127_v13 = vld [vmem:[#allocation2 + $0x238] sm:$0xff]  ;;  %v48_v16 = vld [vmem:[%s1218_s0] sm:$0xff]  ;;  %v837_v17 = vpack.c.bf16 %v122_v8, %v120_v7  ;;  %v965_v19 = vpack.c.bf16 %v250_v11, %v248_v9  ;;  %v254_v25 = vld [vmem:[#allocation2 + $0x630] sm:$0xff] }
  0x56   :  { %v255_v15 = vld [vmem:[#allocation2 + $0x638] sm:$0xff]  ;;  %v52_v18 = vld [vmem:[%s1218_s0 + $0x20] sm:$0xff]  ;;  %v257_v28 = vld [vmem:[#allocation2 + $0x648] sm:$0xff] }
  0x57   :  { %818 = vmatpush1.bf16.msra.mxu1 %v817_v20  ;;  %v839_v20 = vpack.c.bf16 %v127_v13, %v125_v12  ;;  %v252_v23 = vld [vmem:[#allocation2 + $0x620] sm:$0xff]  ;;  %v967_v24 = vpack.c.bf16 %v255_v15, %v253_v14  ;;  %v131_v27 = vld [vmem:[#allocation2 + $0x258] sm:$0xff]  ;;  %v258_v37 = vld [vmem:[#allocation2 + $0x650] sm:$0xff] }
  0x58   :  { %946 = vmatpush1.bf16.msra.mxu0 %v945_v21  ;;  %820 = vmatprep.subr.bf16.mxu1 %v819_v22  ;;  %v124_v21 = vld [vmem:[#allocation2 + $0x220] sm:$0xff]  ;;  %v126_v22 = vld [vmem:[#allocation2 + $0x230] sm:$0xff]  ;;  %v259_v29 = vld [vmem:[#allocation2 + $0x658] sm:$0xff]  ;;  %v969_v31 = vpack.c.bf16 %v254_v25, %v252_v23 }
  0x59   :  { %948 = vmatprep.subr.bf16.mxu0 %v947_v26  ;;  %v129_v26 = vld [vmem:[#allocation2 + $0x248] sm:$0xff]  ;;  %v841_v30 = vpack.c.bf16 %v126_v22, %v124_v21  ;;  %v256_v35 = vld [vmem:[#allocation2 + $0x640] sm:$0xff]  ;;  %v971_v36 = vpack.c.bf16 %v259_v29, %v257_v28  ;;  %v135_v39 = vld [vmem:[#allocation2 + $0x278] sm:$0xff] }
  0x5a   :  { %v261_v40 = vld [vmem:[#allocation2 + $0x668] sm:$0xff]  ;;  %v263_v41 = vld [vmem:[#allocation2 + $0x678] sm:$0xff]  ;;  %v973_v43 = vpack.c.bf16 %v258_v37, %v256_v35  ;;  %v260_v47 = vld [vmem:[#allocation2 + $0x660] sm:$0xff] }
  0x5b   :  { %822 = vmatpush1.bf16.msra.mxu1 %v821_v32  ;;  %v843_v32 = vpack.c.bf16 %v131_v27, %v129_v26  ;;  %v975_v48 = vpack.c.bf16 %v263_v41, %v261_v40  ;;  %v262_v49 = vld [vmem:[#allocation2 + $0x670] sm:$0xff]  ;;  %v139_v51 = vld [vmem:[#allocation2 + $0x298] sm:$0xff]  ;;  %v265_v52 = vld [vmem:[#allocation2 + $0x688] sm:$0xff] }
  0x5c   :  { %950 = vmatpush1.bf16.msra.mxu0 %v949_v33  ;;  %824 = vmatprep.subr.bf16.mxu1 %v823_v34  ;;  %v128_v33 = vld [vmem:[#allocation2 + $0x240] sm:$0xff]  ;;  %v130_v34 = vld [vmem:[#allocation2 + $0x250] sm:$0xff]  ;;  %v267_v53 = vld [vmem:[#allocation2 + $0x698] sm:$0xff]  ;;  %v977_v55 = vpack.c.bf16 %v262_v49, %v260_v47 }
  0x5d   :  { %952 = vmatprep.subr.bf16.mxu0 %v951_v38  ;;  %v133_v38 = vld [vmem:[#allocation2 + $0x268] sm:$0xff]  ;;  %v845_v42 = vpack.c.bf16 %v130_v34, %v128_v33  ;;  %v264_v59 = vld [vmem:[#allocation2 + $0x680] sm:$0xff]  ;;  %v979_v60 = vpack.c.bf16 %v267_v53, %v265_v52  ;;  %v266_v61 = vld [vmem:[#allocation2 + $0x690] sm:$0xff] }
  0x5e   :  { %v143_v63 = vld [vmem:[#allocation2 + $0x2b8] sm:$0xff]  ;;  %v269_v0 = vld [vmem:[#allocation2 + $0x6a8] sm:$0xff]  ;;  %v981_v3 = vpack.c.bf16 %v266_v61, %v264_v59  ;;  %v268_v7 = vld [vmem:[#allocation2 + $0x6a0] sm:$0xff] }
  0x5f   :  { %826 = vmatpush1.bf16.msra.mxu1 %v825_v44  ;;  %v847_v44 = vpack.c.bf16 %v135_v39, %v133_v38  ;;  %v271_v1 = vld [vmem:[#allocation2 + $0x6b8] sm:$0xff]  ;;  %v270_v9 = vld [vmem:[#allocation2 + $0x6b0] sm:$0xff]  ;;  %v273_v12 = vld [vmem:[#allocation2 + $0x6c8] sm:$0xff] }
  0x60   :  { %954 = vmatpush1.bf16.msra.mxu0 %v953_v45  ;;  %828 = vmatprep.subr.bf16.mxu1 %v827_v46  ;;  %v132_v45 = vld [vmem:[#allocation2 + $0x260] sm:$0xff]  ;;  %v134_v46 = vld [vmem:[#allocation2 + $0x270] sm:$0xff]  ;;  %v983_v8 = vpack.c.bf16 %v271_v1, %v269_v0  ;;  %v147_v11 = vld [vmem:[#allocation2 + $0x2d8] sm:$0xff] }
  0x61   :  { %956 = vmatprep.subr.bf16.mxu0 %v955_v50  ;;  %v137_v50 = vld [vmem:[#allocation2 + $0x288] sm:$0xff]  ;;  %v849_v54 = vpack.c.bf16 %v134_v46, %v132_v45  ;;  %v275_v13 = vld [vmem:[#allocation2 + $0x6d8] sm:$0xff]  ;;  %v144_v15 = vld [vmem:[#allocation2 + $0x2c0] sm:$0xff] }
  0x62   :  { %v987_v21 = vpack.c.bf16 %v275_v13, %v273_v12  ;;  %v149_v22 = vld [vmem:[#allocation2 + $0x2e8] sm:$0xff]  ;;  %v151_v23 = vld [vmem:[#allocation2 + $0x2f8] sm:$0xff]  ;;  %v276_v33 = vld [vmem:[#allocation2 + $0x6e0] sm:$0xff] }
  0x63   :  { %830 = vmatpush1.bf16.msra.mxu1 %v829_v56  ;;  %v851_v56 = vpack.c.bf16 %v139_v51, %v137_v50  ;;  %v277_v25 = vld [vmem:[#allocation2 + $0x6e8] sm:$0xff]  ;;  %v279_v26 = vld [vmem:[#allocation2 + $0x6f8] sm:$0xff]  ;;  %v278_v35 = vld [vmem:[#allocation2 + $0x6f0] sm:$0xff] }
  0x64   :  { %958 = vmatpush1.bf16.msra.mxu0 %v957_v57  ;;  %832 = vmatprep.subr.bf16.mxu1 %v831_v58  ;;  %v136_v57 = vld [vmem:[#allocation2 + $0x280] sm:$0xff]  ;;  %v138_v58 = vld [vmem:[#allocation2 + $0x290] sm:$0xff]  ;;  %v55_v27 = vld [vmem:[%s1218_s0 + $0x38] sm:$0xff]  ;;  %v991_v34 = vpack.c.bf16 %v279_v26, %v277_v25  ;;  %v993_v41 = vpack.c.bf16 %v278_v35, %v276_v33 }
  0x65   :  { %960 = vmatprep.subr.bf16.mxu0 %v959_v62  ;;  %v141_v62 = vld [vmem:[#allocation2 + $0x2a8] sm:$0xff]  ;;  %v853_v2 = vpack.c.bf16 %v138_v58, %v136_v57  ;;  %v155_v37 = vld [vmem:[#allocation2 + $0x318] sm:$0xff]  ;;  %v280_v45 = vld [vmem:[#allocation2 + $0x700] sm:$0xff] }
  0x66   :  { %v281_v38 = vld [vmem:[#allocation2 + $0x708] sm:$0xff]  ;;  %v283_v39 = vld [vmem:[#allocation2 + $0x718] sm:$0xff]  ;;  %v282_v47 = vld [vmem:[#allocation2 + $0x710] sm:$0xff] }
  0x67   :  { %834 = vmatpush1.bf16.msra.mxu1 %v833_v4  ;;  %v855_v4 = vpack.c.bf16 %v143_v63, %v141_v62  ;;  %v995_v46 = vpack.c.bf16 %v283_v39, %v281_v38  ;;  %v159_v49 = vld [vmem:[#allocation2 + $0x338] sm:$0xff]  ;;  %v285_v50 = vld [vmem:[#allocation2 + $0x728] sm:$0xff]  ;;  %v997_v53 = vpack.c.bf16 %v282_v47, %v280_v45  ;;  %v284_v57 = vld [vmem:[#allocation2 + $0x720] sm:$0xff] }
  0x68   :  { %962 = vmatpush1.bf16.msra.mxu0 %v961_v5  ;;  %836 = vmatprep.subr.bf16.mxu1 %v835_v6  ;;  %v140_v5 = vld [vmem:[#allocation2 + $0x2a0] sm:$0xff]  ;;  %v142_v6 = vld [vmem:[#allocation2 + $0x2b0] sm:$0xff]  ;;  %v287_v51 = vld [vmem:[#allocation2 + $0x738] sm:$0xff] }
  0x69   :  { %964 = vmatprep.subr.bf16.mxu0 %v963_v10  ;;  %v145_v10 = vld [vmem:[#allocation2 + $0x2c8] sm:$0xff]  ;;  %v857_v14 = vpack.c.bf16 %v142_v6, %v140_v5  ;;  %v999_v58 = vpack.c.bf16 %v287_v51, %v285_v50  ;;  %v286_v59 = vld [vmem:[#allocation2 + $0x730] sm:$0xff]  ;;  %v163_v61 = vld [vmem:[#allocation2 + $0x358] sm:$0xff] }
  0x6a   :  { %389 = vmatmul.mubr.f32.vlgmr.msra.gmra.mrb[0].mxu1 %v48_v16  ;;  %v985_v16 = vpack.c.bf16 %v270_v9, %v268_v7  ;;  %v289_v62 = vld [vmem:[#allocation2 + $0x748] sm:$0xff]  ;;  %v291_v63 = vld [vmem:[#allocation2 + $0x758] sm:$0xff]  ;;  %v1001_v1 = vpack.c.bf16 %v286_v59, %v284_v57  ;;  %v288_v5 = vld [vmem:[#allocation2 + $0x740] sm:$0xff] }
  0x6b   :  { %838 = vmatpush1.bf16.msra.mxu1 %v837_v17  ;;  %531 = vmatmul.mubr.f32.vlgmr.msra.gmra.mrb[0].mxu0 %v52_v18  ;;  %v859_v17 = vpack.c.bf16 %v147_v11, %v145_v10  ;;  %v146_v18 = vld [vmem:[#allocation2 + $0x2d0] sm:$0xff]  ;;  %v1003_v6 = vpack.c.bf16 %v291_v63, %v289_v62  ;;  %v167_v9 = vld [vmem:[#allocation2 + $0x378] sm:$0xff]  ;;  %v293_v10 = vld [vmem:[#allocation2 + $0x768] sm:$0xff] }
  0x6c   :  { %966 = vmatpush1.bf16.msra.mxu0 %v965_v19  ;;  %840 = vmatprep.subr.bf16.mxu1 %v839_v20  ;;  %v272_v19 = vld [vmem:[#allocation2 + $0x6c0] sm:$0xff]  ;;  %v274_v20 = vld [vmem:[#allocation2 + $0x6d0] sm:$0xff]  ;;  %v861_v28 = vpack.c.bf16 %v146_v18, %v144_v15  ;;  %v295_v11 = vld [vmem:[#allocation2 + $0x778] sm:$0xff] }
  0x6d   :  { %968 = vmatprep.subr.bf16.mxu0 %v967_v24  ;;  %v51_v24 = vld [vmem:[%s1218_s0 + $0x18] sm:$0xff]  ;;  %601 = vmatprep.mubr.f32.mxu0 %v55_v27  ;;  %v989_v29 = vpack.c.bf16 %v274_v20, %v272_v19  ;;  %v290_v7 = vld [vmem:[#allocation2 + $0x750] sm:$0xff]  ;;  %v164_v15 = vld [vmem:[#allocation2 + $0x360] sm:$0xff]  ;;  %v1007_v18 = vpack.c.bf16 %v295_v11, %v293_v10 }
  0x6e   :  { %459 = vmatprep.mubr.f32.mxu1 %v51_v24  ;;  %v1005_v13 = vpack.c.bf16 %v290_v7, %v288_v5  ;;  %v294_v19 = vld [vmem:[#allocation2 + $0x770] sm:$0xff]  ;;  %v169_v20 = vld [vmem:[#allocation2 + $0x388] sm:$0xff]  ;;  %v168_v27 = vld [vmem:[#allocation2 + $0x380] sm:$0xff] }
  0x6f   :  { %842 = vmatpush1.bf16.msra.mxu1 %v841_v30  ;;  %v863_v30 = vpack.c.bf16 %v151_v23, %v149_v22  ;;  %v297_v22 = vld [vmem:[#allocation2 + $0x788] sm:$0xff]  ;;  %v299_v23 = vld [vmem:[#allocation2 + $0x798] sm:$0xff]  ;;  %v172_v39 = vld [vmem:[#allocation2 + $0x3a0] sm:$0xff] }
  0x70   :  { %970 = vmatpush1.bf16.msra.mxu0 %v969_v31  ;;  %844 = vmatprep.subr.bf16.mxu1 %v843_v32  ;;  %v148_v31 = vld [vmem:[#allocation2 + $0x2e0] sm:$0xff]  ;;  %v150_v32 = vld [vmem:[#allocation2 + $0x2f0] sm:$0xff]  ;;  %v175_v33 = vld [vmem:[#allocation2 + $0x3b8] sm:$0xff] }
  0x71   :  { %972 = vmatprep.subr.bf16.mxu0 %v971_v36  ;;  %v153_v36 = vld [vmem:[#allocation2 + $0x308] sm:$0xff]  ;;  %v865_v40 = vpack.c.bf16 %v150_v32, %v148_v31  ;;  %v298_v31 = vld [vmem:[#allocation2 + $0x790] sm:$0xff]  ;;  %v303_v35 = vld [vmem:[#allocation2 + $0x7b8] sm:$0xff] }
  0x72   :  { %v173_v32 = vld [vmem:[#allocation2 + $0x3a8] sm:$0xff]  ;;  %v179_v45 = vld [vmem:[#allocation2 + $0x3d8] sm:$0xff]  ;;  %v176_v51 = vld [vmem:[#allocation2 + $0x3c0] sm:$0xff] }
  0x73   :  { %846 = vmatpush1.bf16.msra.mxu1 %v845_v42  ;;  %v867_v42 = vpack.c.bf16 %v155_v37, %v153_v36  ;;  %v887_v38 = vpack.c.bf16 %v175_v33, %v173_v32  ;;  %v307_v47 = vld [vmem:[#allocation2 + $0x7d8] sm:$0xff]  ;;  %v180_v63 = vld [vmem:[#allocation2 + $0x3e0] sm:$0xff]  ;;  %v627_v5 = vld [vmem:[#allocation4 + $0x88] sm:$0xff] }
  0x74   :  { %974 = vmatpush1.bf16.msra.mxu0 %v973_v43  ;;  %848 = vmatprep.subr.bf16.mxu1 %v847_v44  ;;  %v152_v43 = vld [vmem:[#allocation2 + $0x300] sm:$0xff]  ;;  %v154_v44 = vld [vmem:[#allocation2 + $0x310] sm:$0xff]  ;;  %v183_v57 = vld [vmem:[#allocation2 + $0x3f8] sm:$0xff] }
  0x75   :  { %976 = vmatprep.subr.bf16.mxu0 %v975_v48  ;;  %v157_v48 = vld [vmem:[#allocation2 + $0x328] sm:$0xff]  ;;  %v869_v52 = vpack.c.bf16 %v154_v44, %v152_v43  ;;  %v302_v43 = vld [vmem:[#allocation2 + $0x7b0] sm:$0xff]  ;;  %v311_v59 = vld [vmem:[#allocation2 + $0x7f8] sm:$0xff] }
  0x76   :  { %v177_v44 = vld [vmem:[#allocation2 + $0x3c8] sm:$0xff]  ;;  %v628_v11 = vld [vmem:[#allocation4 + $0x90] sm:$0xff] }
  0x77   :  { %850 = vmatpush1.bf16.msra.mxu1 %v849_v54  ;;  %v871_v54 = vpack.c.bf16 %v159_v49, %v157_v48  ;;  %v891_v50 = vpack.c.bf16 %v179_v45, %v177_v44  ;;  %v611_v10 = vld [vmem:[#allocation4 + $0x8] sm:$0xff]  ;;  %v638_v44 = vld [vmem:[#allocation4 + $0xe0] sm:$0xff] }
  0x78   :  { %978 = vmatpush1.bf16.msra.mxu0 %v977_v55  ;;  %852 = vmatprep.subr.bf16.mxu1 %v851_v56  ;;  %v156_v55 = vld [vmem:[#allocation2 + $0x320] sm:$0xff]  ;;  %v158_v56 = vld [vmem:[#allocation2 + $0x330] sm:$0xff]  ;;  %v635_v32 = vld [vmem:[#allocation4 + $0xc8] sm:$0xff] }
  0x79   :  { %980 = vmatprep.subr.bf16.mxu0 %v979_v60  ;;  %v161_v60 = vld [vmem:[#allocation2 + $0x348] sm:$0xff]  ;;  %v873_v0 = vpack.c.bf16 %v158_v56, %v156_v55  ;;  %v306_v55 = vld [vmem:[#allocation2 + $0x7d0] sm:$0xff] }
  0x7a   :  { %v181_v56 = vld [vmem:[#allocation2 + $0x3e8] sm:$0xff] }
  0x7b   :  { %854 = vmatpush1.bf16.msra.mxu1 %v853_v2  ;;  %v875_v2 = vpack.c.bf16 %v163_v61, %v161_v60  ;;  %v895_v62 = vpack.c.bf16 %v183_v57, %v181_v56  ;;  %v639_v45 = vld [vmem:[#allocation4 + $0xe8] sm:$0xff]  ;;  %v314_v56 = vlaneseq }
  0x7c   :  { %982 = vmatpush1.bf16.msra.mxu0 %v981_v3  ;;  %856 = vmatprep.subr.bf16.mxu1 %v855_v4  ;;  %v160_v3 = vld [vmem:[#allocation2 + $0x340] sm:$0xff]  ;;  %v162_v4 = vld [vmem:[#allocation2 + $0x350] sm:$0xff] }
  0x7d   :  { %984 = vmatprep.subr.bf16.mxu0 %v983_v8  ;;  %v165_v8 = vld [vmem:[#allocation2 + $0x368] sm:$0xff]  ;;  %v877_v12 = vpack.c.bf16 %v162_v4, %v160_v3  ;;  %v310_v3 = vld [vmem:[#allocation2 + $0x7f0] sm:$0xff]  ;;  %v626_v4 = vld [vmem:[#allocation4 + $0x80] sm:$0xff]  ;;  %v315_v57 = vshrl.u32 %v314_v56, 7 }
  0x7f   :  { %858 = vmatpush1.bf16.msra.mxu1 %v857_v14  ;;  %v879_v14 = vpack.c.bf16 %v167_v9, %v165_v8  ;;  %v1027_v8 = vpack.c.bf16 %v627_v5, %v626_v4  ;;  %v610_v9 = vld [vmem:[#allocation4] sm:$0xff] }
  0x80   :  { %986 = vmatpush1.bf16.msra.mxu0 %v985_v16  ;;  %860 = vmatprep.subr.bf16.mxu1 %v859_v17  ;;  %v166_v16 = vld [vmem:[#allocation2 + $0x370] sm:$0xff]  ;;  %v292_v17 = vld [vmem:[#allocation2 + $0x760] sm:$0xff] }
  0x81   :  { %988 = vmatprep.subr.bf16.mxu0 %v987_v21  ;;  %v171_v21 = vld [vmem:[#allocation2 + $0x398] sm:$0xff]  ;;  %v881_v24 = vpack.c.bf16 %v166_v16, %v164_v15  ;;  %v1009_v25 = vpack.c.bf16 %v294_v19, %v292_v17  ;;  %v54_v15 = vld [vmem:[%s1218_s0 + $0x30] sm:$0xff]  ;;  %v630_v19 = vld [vmem:[#allocation4 + $0xa0] sm:$0xff] }
  0x82   :  { %v883_v26 = vpack.c.bf16 %v171_v21, %v169_v20  ;;  %v612_v17 = vld [vmem:[#allocation4 + $0x10] sm:$0xff]  ;;  %v631_v20 = vld [vmem:[#allocation4 + $0xa8] sm:$0xff] }
  0x83   :  { %862 = vmatpush1.bf16.msra.mxu1 %v861_v28  ;;  %v170_v28 = vld [vmem:[#allocation2 + $0x390] sm:$0xff] }
  0x84   :  { %990 = vmatpush1.bf16.msra.mxu0 %v989_v29  ;;  %864 = vmatprep.subr.bf16.mxu1 %v863_v30  ;;  %v296_v29 = vld [vmem:[#allocation2 + $0x780] sm:$0xff]  ;;  %v1011_v30 = vpack.c.bf16 %v299_v23, %v297_v22  ;;  %v885_v36 = vpack.c.bf16 %v170_v28, %v168_v27  ;;  %v1035_v22 = vpack.c.bf16 %v631_v20, %v630_v19 }
  0x85   :  { %992 = vmatprep.subr.bf16.mxu0 %v991_v34  ;;  %v301_v34 = vld [vmem:[#allocation2 + $0x7a8] sm:$0xff]  ;;  %v1013_v37 = vpack.c.bf16 %v298_v31, %v296_v29  ;;  %v614_v23 = vld [vmem:[#allocation4 + $0x20] sm:$0xff]  ;;  %v616_v29 = vld [vmem:[#allocation4 + $0x30] sm:$0xff] }
  0x86   :  { %v634_v31 = vld [vmem:[#allocation4 + $0xc0] sm:$0xff] }
  0x87   :  { %866 = vmatpush1.bf16.msra.mxu1 %v865_v40  ;;  %v174_v40 = vld [vmem:[#allocation2 + $0x3b0] sm:$0xff] }
  0x88   :  { %994 = vmatpush1.bf16.msra.mxu0 %v993_v41  ;;  %868 = vmatprep.subr.bf16.mxu1 %v867_v42  ;;  %v300_v41 = vld [vmem:[#allocation2 + $0x7a0] sm:$0xff]  ;;  %v1015_v42 = vpack.c.bf16 %v303_v35, %v301_v34  ;;  %v889_v48 = vpack.c.bf16 %v174_v40, %v172_v39  ;;  %v1043_v34 = vpack.c.bf16 %v635_v32, %v634_v31 }
  0x89   :  { %996 = vmatprep.subr.bf16.mxu0 %v995_v46  ;;  %v305_v46 = vld [vmem:[#allocation2 + $0x7c8] sm:$0xff]  ;;  %v1017_v49 = vpack.c.bf16 %v302_v43, %v300_v41  ;;  %v618_v35 = vld [vmem:[#allocation4 + $0x40] sm:$0xff]  ;;  %v620_v41 = vld [vmem:[#allocation4 + $0x50] sm:$0xff] }
  0x8b   :  { %870 = vmatpush1.bf16.msra.mxu1 %v869_v52  ;;  %v178_v52 = vld [vmem:[#allocation2 + $0x3d0] sm:$0xff] }
  0x8c   :  { %998 = vmatpush1.bf16.msra.mxu0 %v997_v53  ;;  %872 = vmatprep.subr.bf16.mxu1 %v871_v54  ;;  %v304_v53 = vld [vmem:[#allocation2 + $0x7c0] sm:$0xff]  ;;  %v1019_v54 = vpack.c.bf16 %v307_v47, %v305_v46  ;;  %v893_v60 = vpack.c.bf16 %v178_v52, %v176_v51  ;;  %v1051_v46 = vpack.c.bf16 %v639_v45, %v638_v44  ;;  %v641_v51 = vld [vmem:[#allocation4 + $0xf8] sm:$0xff] }
  0x8d   :  { %1000 = vmatprep.subr.bf16.mxu0 %v999_v58  ;;  %v309_v58 = vld [vmem:[#allocation2 + $0x7e8] sm:$0xff]  ;;  %v1021_v61 = vpack.c.bf16 %v306_v55, %v304_v53  ;;  %v622_v47 = vld [vmem:[#allocation4 + $0x60] sm:$0xff]  ;;  %v624_v53 = vld [vmem:[#allocation4 + $0x70] sm:$0xff] }
  0x8f   :  { %874 = vmatpush1.bf16.msra.mxu1 %v873_v0  ;;  %v182_v0 = vld [vmem:[#allocation2 + $0x3f0] sm:$0xff] }
  0x90   :  { %1002 = vmatpush1.bf16.msra.mxu0 %v1001_v1  ;;  %876 = vmatprep.subr.bf16.mxu1 %v875_v2  ;;  %v308_v1 = vld [vmem:[#allocation2 + $0x7e0] sm:$0xff]  ;;  %v1023_v2 = vpack.c.bf16 %v311_v59, %v309_v58  ;;  %v316_v58 = vsub.s32 0, %v315_v57 }
  0x91   :  { %1004 = vmatprep.subr.bf16.mxu0 %v1003_v6  ;;  %v897_v6 = vpack.c.bf16 %v182_v0, %v180_v63  ;;  %v1025_v7 = vpack.c.bf16 %v310_v3, %v308_v1  ;;  %v312_v59 = vld [vmem:[%s1220_s2] sm:$0x3] }
  0x93   :  { %878 = vmatpush1.bf16.msra.mxu1 %v877_v12  ;;  %v629_v12 = vld [vmem:[#allocation4 + $0x98] sm:$0xff] }
  0x94   :  { %1006 = vmatpush1.bf16.msra.mxu0 %v1005_v13  ;;  %880 = vmatprep.subr.bf16.mxu1 %v879_v14  ;;  %v50_v13 = vld [vmem:[%s1218_s0 + $0x10] sm:$0xff]  ;;  %v1029_v14 = vpack.c.bf16 %v611_v10, %v610_v9  ;;  %v1031_v16 = vpack.c.bf16 %v629_v12, %v628_v11  ;;  %v735_v10 = vld [vmem:[%s1222_s4] ss:$0 sm:$0xff] }
  0x95   :  { %1008 = vmatprep.subr.bf16.mxu0 %v1007_v18  ;;  %v613_v18 = vld [vmem:[#allocation4 + $0x18] sm:$0xff] }
  0x96   :  { %v1033_v21 = vpack.c.bf16 %v613_v18, %v612_v17 }
  0x97   :  { %882 = vmatpush1.bf16.msra.mxu1 %v881_v24  ;;  %v615_v24 = vld [vmem:[#allocation4 + $0x28] sm:$0xff] }
  0x98   :  { %1010 = vmatpush1.bf16.msra.mxu0 %v1009_v25  ;;  %884 = vmatprep.subr.bf16.mxu1 %v883_v26  ;;  %v632_v25 = vld [vmem:[#allocation4 + $0xb0] sm:$0xff]  ;;  %v633_v26 = vld [vmem:[#allocation4 + $0xb8] sm:$0xff]  ;;  %v1037_v27 = vpack.c.bf16 %v615_v24, %v614_v23 }
  0x99   :  { %1012 = vmatprep.subr.bf16.mxu0 %v1011_v30  ;;  %v1039_v28 = vpack.c.bf16 %v633_v26, %v632_v25  ;;  %v617_v30 = vld [vmem:[#allocation4 + $0x38] sm:$0xff] }
  0x9a   :  { %v1041_v33 = vpack.c.bf16 %v617_v30, %v616_v29 }
  0x9b   :  { %886 = vmatpush1.bf16.msra.mxu1 %v885_v36  ;;  %v619_v36 = vld [vmem:[#allocation4 + $0x48] sm:$0xff] }
  0x9c   :  { %1014 = vmatpush1.bf16.msra.mxu0 %v1013_v37  ;;  %888 = vmatprep.subr.bf16.mxu1 %v887_v38  ;;  %v636_v37 = vld [vmem:[#allocation4 + $0xd0] sm:$0xff]  ;;  %v637_v38 = vld [vmem:[#allocation4 + $0xd8] sm:$0xff]  ;;  %v1045_v39 = vpack.c.bf16 %v619_v36, %v618_v35 }
  0x9d   :  { %1016 = vmatprep.subr.bf16.mxu0 %v1015_v42  ;;  %v1047_v40 = vpack.c.bf16 %v637_v38, %v636_v37  ;;  %v621_v42 = vld [vmem:[#allocation4 + $0x58] sm:$0xff] }
  0x9e   :  { %v1049_v43 = vpack.c.bf16 %v621_v42, %v620_v41 }
  0x9f   :  { %890 = vmatpush1.bf16.msra.mxu1 %v889_v48  ;;  %v623_v48 = vld [vmem:[#allocation4 + $0x68] sm:$0xff] }
  0xa0   :  { %1018 = vmatpush1.bf16.msra.mxu0 %v1017_v49  ;;  %892 = vmatprep.subr.bf16.mxu1 %v891_v50  ;;  %v1053_v49 = vpack.c.bf16 %v623_v48, %v622_v47  ;;  %v640_v50 = vld [vmem:[#allocation4 + $0xf0] sm:$0xff] }
  0xa1   :  { %1020 = vmatprep.subr.bf16.mxu0 %v1019_v54  ;;  %v1055_v52 = vpack.c.bf16 %v641_v51, %v640_v50  ;;  %v625_v54 = vld [vmem:[#allocation4 + $0x78] sm:$0xff] }
  0xa2   :  { %v1057_v55 = vpack.c.bf16 %v625_v54, %v624_v53 }
  0xa3   :  { %894 = vmatpush1.bf16.msra.mxu1 %v893_v60  ;;  %v320_v60 = vsub.s32 1, %v315_v57 }
  0xa4   :  { %1022 = vmatpush1.bf16.msra.mxu0 %v1021_v61  ;;  %896 = vmatprep.subr.bf16.mxu1 %v895_v62  ;;  %v317_v61 = vrot.slane %v312_v59, %v316_v58 }
  0xa5   :  { %1024 = vmatprep.subr.bf16.mxu0 %v1023_v2  ;;  %v321_v62 = vrot.slane %v312_v59, %v320_v60 }
  0xa7   :  { %898 = vmatpush1.bf16.msra.mxu1 %v897_v6 }
  0xa8   :  { %1026 = vmatpush1.bf16.msra.mxu0 %v1025_v7  ;;  %1028 = vmatprep.subr.bf16.mxu1 %v1027_v8 }
  0xaa   :  { %460 = vmatmul.mubr.f32.vlgmr.msra.gmra.mrb[0].mxu1 %v50_v13 }
  0xab   :  { %602 = vmatmul.mubr.f32.vlgmr.msra.gmra.mrb[0].mxu0 %v54_v15  ;;  %1030 = vmatpush3.bf16.msra.mxu1 %v1029_v14 }
  0xac   :  { %1032 = vmatprep.subr.bf16.mxu1 %v1031_v16 }
  0xaf   :  { %1034 = vmatpush3.bf16.msra.mxu1 %v1033_v21 }
  0xb0   :  { %1036 = vmatprep.subr.bf16.mxu1 %v1035_v22 }
  0xb3   :  { %1038 = vmatpush3.bf16.msra.mxu1 %v1037_v27 }
  0xb4   :  { %1040 = vmatprep.subr.bf16.mxu1 %v1039_v28 }
  0xb7   :  { %1042 = vmatpush3.bf16.msra.mxu1 %v1041_v33 }
  0xb8   :  { %1044 = vmatprep.subr.bf16.mxu1 %v1043_v34 }
  0xbb   :  { %1046 = vmatpush3.bf16.msra.mxu1 %v1045_v39 }
  0xbc   :  { %1048 = vmatprep.subr.bf16.mxu1 %v1047_v40 }
  0xbf   :  { %1050 = vmatpush3.bf16.msra.mxu1 %v1049_v43 }
  0xc0   :  { %1052 = vmatprep.subr.bf16.mxu1 %v1051_v46 }
  0xc3   :  { %1054 = vmatpush3.bf16.msra.mxu1 %v1053_v49 }
  0xc4   :  { %1056 = vmatprep.subr.bf16.mxu1 %v1055_v52 }
  0xc7   :  { %1058 = vmatpush3.bf16.msra.mxu1 %v1057_v55 }
 0x17d   :  { %v461_v63 = vpop.f32.mrb[0].mxu1 }
 0x17e   :  { %v1059_v0 = vadd.f32 %v461_v63, %v317_v61  ;;  %v603_v1 = vpop.f32.mrb[0].mxu0  ;;  %v463_v2 = vpop.f32.mrb[1].mxu1 }
 0x17f   :  { %v1061_v3 = vadd.f32 %v463_v2, %v321_v62  ;;  %v605_v4 = vpop.f32.mrb[1].mxu0 }
 0x180   :  { %v1060_v5 = vadd.f32 %v1059_v0, %v603_v1 }
 0x181   :  { %v1062_v6 = vadd.f32 %v1061_v3, %v605_v4 }
 0x182   :  { %v608_v8 = vmax.f32 %v1060_v5, 0.0 }
 0x183   :  { %v609_v7 = vmax.f32 %v1062_v6, 0.0 }
 0x185   :  { %713 = vmatprep.mubr.f32.mxu1 %v609_v7 }
 0x186   :  { %714 = vmatmul.mubr.f32.vlgmr.msra.gmra.mrb[2].mxu1 %v608_v8 }
 0x259   :  { %v768_v9 = vpop.f32.mrb[2].mxu1 }
 0x25a   :  { %v769_v11 = vpop.f32.mrb[3].mxu1 }
 0x25b   :  { %v770_v12 = vadd.f32 %v769_v11, %v768_v9 }
 0x25d   :  { %v716_v13 = vadd.f32 %v770_v12, %v735_v10 }
 0x25f   :  { %v720_v14 = vand.u32 2147483647, %v716_v13  ;;  %v719_v20 = vmax.f32 %v716_v13, 0.0 }
 0x261   :  { %v721_v15 = vsub.f32 0.0, %v720_v14 }
 0x263   :  { %v722_v16 = vmul.f32 1.442695, %v721_v15 }
 0x265   :  { %1073 = vpow2.f32 %v722_v16 }
 0x26f   :  { %v1074_v17 = vpop.eup %1073 }
 0x270   :  { %v724_v18 = vadd.f32 1.0, %v1074_v17 }
 0x272   :  { %1075 = vlog2.f32 %v724_v18 }
 0x27c   :  { %v1076_v19 = vpop.eup %1075 }
 0x27d   :  { %v726_v21 = vmul.f32 0.6931472, %v1076_v19 }
 0x27f   :  { %v727_v22 = vadd.f32 %v726_v21, %v719_v20 }
 0x281   :  { %728 = vst [vmem:[%s1223_s5] sm:$0xff] %v727_v22 }
 0x282   :  { %733 = vsyncpa [#allocation3], 1 }
 0x283   :  { %734 = vsyncpa [#allocation5], 1 }

</bundles_post_ra>
